<compile_context>
chip_gen: v6e
topology: v6e:2x2x1
jax: 0.10.0
libtpu: 0.0.40
codegen_flags: <defaults>
</compile_context>

<pallas_src>
import jax
import jax.numpy as jnp
from jax import lax
from jax.experimental import pallas as pl
from jax.experimental.pallas import tpu as pltpu


def _round_up(x, m):
    return ((x + m - 1) // m) * m


def self_output_kernel(x_ref, res_ref, w_ref, b_ref, gamma_ref, beta_ref, o_ref):
    # x_ref, res_ref: (tm, H)   w_ref: (H_out, H_in) torch layout
    # b_ref/gamma_ref/beta_ref: (1, H)   o_ref: (tm, H)

    # Dense: x @ W^T, contracting dim 1 of both operands (no wrapper transpose).
    # Native-dtype operands, f32 accumulation on the MXU.
    h = lax.dot_general(
        x_ref[...], w_ref[...],
        dimension_numbers=(((1,), (1,)), ((), ())),
        preferred_element_type=jnp.float32,
    )
    h = h + b_ref[...].astype(jnp.float32)

    # Dropout: identity in eval mode.

    # Residual add + BertLayerNorm (biased variance, eps=1e-12), math in f32.
    y = h + res_ref[...].astype(jnp.float32)
    mean = jnp.mean(y, axis=-1, keepdims=True)
    cent = y - mean
    var = jnp.mean(cent * cent, axis=-1, keepdims=True)
    y = cent * lax.rsqrt(var + 1e-12)
    y = y * gamma_ref[...].astype(jnp.float32) + beta_ref[...].astype(jnp.float32)

    o_ref[...] = y.astype(o_ref.dtype)


def bert_self_output(hidden_states, input_tensor, dense_w, dense_b, gamma, beta,
                     *, tm=256):
    """hidden_states, input_tensor: [B, S, H]; dense_w: [H, H] (out, in torch
    layout); dense_b, gamma, beta: [H]. Returns [B, S, H]."""
    B, S, H = hidden_states.shape
    M = B * S

    # Pick the row tile: large for real shapes, shrunk (multiple of 8 sublanes)
    # for tiny inputs; pad rows so the grid covers M exactly.
    tm = min(tm, _round_up(M, 8))
    Mp = _round_up(M, tm)

    x2d = hidden_states.reshape(M, H)
    r2d = input_tensor.reshape(M, H)
    if Mp != M:
        pad = ((0, Mp - M), (0, 0))
        x2d = jnp.pad(x2d, pad)
        r2d = jnp.pad(r2d, pad)

    b_2d = dense_b.reshape(1, H)
    gamma_2d = gamma.reshape(1, H)
    beta_2d = beta.reshape(1, H)

    grid = (Mp // tm,)
    out2d = pl.pallas_call(
        self_output_kernel,
        out_shape=jax.ShapeDtypeStruct((Mp, H), hidden_states.dtype),
        grid_spec=pltpu.PrefetchScalarGridSpec(
            num_scalar_prefetch=0,
            grid=grid,
            in_specs=[
                pl.BlockSpec((tm, H), lambda i: (i, 0)),   # hidden_states tile
                pl.BlockSpec((tm, H), lambda i: (i, 0)),   # residual tile
                pl.BlockSpec((H, H), lambda i: (0, 0)),    # dense W (out, in), resident
                pl.BlockSpec((1, H), lambda i: (0, 0)),    # dense bias
                pl.BlockSpec((1, H), lambda i: (0, 0)),    # LN gamma
                pl.BlockSpec((1, H), lambda i: (0, 0)),    # LN beta
            ],
            out_specs=pl.BlockSpec((tm, H), lambda i: (i, 0)),
        ),
        compiler_params=pltpu.CompilerParams(
            dimension_semantics=("parallel",)),
    )(x2d, r2d, dense_w, b_2d, gamma_2d, beta_2d)

    if Mp != M:
        out2d = out2d[:M]
    return out2d.reshape(B, S, H)


def reference(hidden_states, input_tensor, dense_w, dense_b, gamma, beta):
    h = hidden_states.astype(jnp.float32) @ dense_w.T.astype(jnp.float32) + dense_b
    y = h + input_tensor.astype(jnp.float32)
    mean = jnp.mean(y, axis=-1, keepdims=True)
    var = jnp.mean((y - mean) ** 2, axis=-1, keepdims=True)
    return (y - mean) * lax.rsqrt(var + 1e-12) * gamma + beta


if __name__ == "__main__":
    # Small shapes consistent with the module: batch=2, seq=8, hidden=32.
    B, S, H = 2, 8, 32
    key = jax.random.PRNGKey(0)
    k = jax.random.split(key, 6)

    hidden_states = jax.random.normal(k[0], (B, S, H), dtype=jnp.float32)
    input_tensor = jax.random.normal(k[1], (B, S, H), dtype=jnp.float32)
    dense_w = 0.02 * jax.random.normal(k[2], (H, H), dtype=jnp.float32)   # (out, in)
    dense_b = 0.02 * jax.random.normal(k[3], (H,), dtype=jnp.float32)
    gamma = jnp.ones((H,), dtype=jnp.float32) + 0.01 * jax.random.normal(k[4], (H,))
    beta = 0.01 * jax.random.normal(k[5], (H,), dtype=jnp.float32)

    out = bert_self_output(hidden_states, input_tensor, dense_w, dense_b, gamma, beta)
    out = jax.block_until_ready(out)

    ref = reference(hidden_states, input_tensor, dense_w, dense_b, gamma, beta)
    assert out.shape == (B, S, H)
    assert jnp.allclose(out, ref, atol=1e-4, rtol=1e-4), float(jnp.max(jnp.abs(out - ref)))
    print("KERNEL_OK")
</pallas_src>

<mosaic_0001>
module attributes {stable_mosaic.version = 11 : i64} {
  func.func @self_output_kernel(%arg0: i32, %arg1: memref<16x32xf32, #tpu.memory_space<vmem>>, %arg2: memref<16x32xf32, #tpu.memory_space<vmem>>, %arg3: memref<32x32xf32, #tpu.memory_space<vmem>>, %arg4: memref<1x32xf32, #tpu.memory_space<vmem>>, %arg5: memref<1x32xf32, #tpu.memory_space<vmem>>, %arg6: memref<1x32xf32, #tpu.memory_space<vmem>>, %arg7: memref<16x32xf32, #tpu.memory_space<vmem>>) attributes {dimension_semantics = [#tpu.dimension_semantics<parallel>], iteration_bounds = array<i64: 1>, scalar_prefetch = 0 : i64, scratch_operands = 0 : i64, tpu.core_type = #tpu.core_type<tc>, window_params = [{transform_indices = @transform_0, window_bounds = array<i64: 16, 32>}, {transform_indices = @transform_1, window_bounds = array<i64: 16, 32>}, {pipeline_mode = #tpu.pipeline_mode<synchronous>, transform_indices = @transform_2, window_bounds = array<i64: 32, 32>}, {pipeline_mode = #tpu.pipeline_mode<synchronous>, transform_indices = @transform_3, window_bounds = array<i64: 1, 32>}, {pipeline_mode = #tpu.pipeline_mode<synchronous>, transform_indices = @transform_4, window_bounds = array<i64: 1, 32>}, {pipeline_mode = #tpu.pipeline_mode<synchronous>, transform_indices = @transform_5, window_bounds = array<i64: 1, 32>}, {transform_indices = @transform_6, window_bounds = array<i64: 16, 32>}]} {
    %c0 = arith.constant 0 : index
    %c0_0 = arith.constant 0 : index
    %0 = vector.load %arg1[%c0, %c0_0] : memref<16x32xf32, #tpu.memory_space<vmem>>, vector<16x32xf32>
    %c0_1 = arith.constant 0 : index
    %c0_2 = arith.constant 0 : index
    %1 = vector.load %arg3[%c0_1, %c0_2] : memref<32x32xf32, #tpu.memory_space<vmem>>, vector<32x32xf32>
    %cst = arith.constant dense<0.000000e+00> : vector<16x32xf32>
    %2 = tpu.matmul %0, %1, %cst {dimension_numbers = #tpu.dot_dimension_numbers<[1], [1], [0], [0], [0, 0, 1, 0], [], []>} : vector<16x32xf32>, vector<32x32xf32>, vector<16x32xf32> -> vector<16x32xf32>
    %c0_3 = arith.constant 0 : index
    %c0_4 = arith.constant 0 : index
    %3 = vector.load %arg4[%c0_3, %c0_4] : memref<1x32xf32, #tpu.memory_space<vmem>>, vector<1x32xf32>
    %4 = vector.broadcast %3 : vector<1x32xf32> to vector<16x32xf32>
    %5 = arith.addf %2, %4 : vector<16x32xf32>
    %c0_5 = arith.constant 0 : index
    %c0_6 = arith.constant 0 : index
    %6 = vector.load %arg2[%c0_5, %c0_6] : memref<16x32xf32, #tpu.memory_space<vmem>>, vector<16x32xf32>
    %7 = arith.addf %5, %6 : vector<16x32xf32>
    %cst_7 = arith.constant dense<0.000000e+00> : vector<16xf32>
    %8 = vector.multi_reduction <add>, %7, %cst_7 [1] : vector<16x32xf32> to vector<16xf32>
    %9 = vector.shape_cast %8 : vector<16xf32> to vector<16x1xf32>
    %cst_8 = arith.constant 3.200000e+01 : f32
    %10 = vector.broadcast %cst_8 : f32 to vector<16x1xf32>
    %11 = arith.divf %9, %10 : vector<16x1xf32>
    %12 = vector.broadcast %11 : vector<16x1xf32> to vector<16x32xf32>
    %13 = arith.subf %7, %12 : vector<16x32xf32>
    %14 = arith.mulf %13, %13 : vector<16x32xf32>
    %cst_9 = arith.constant dense<0.000000e+00> : vector<16xf32>
    %15 = vector.multi_reduction <add>, %14, %cst_9 [1] : vector<16x32xf32> to vector<16xf32>
    %16 = vector.shape_cast %15 : vector<16xf32> to vector<16x1xf32>
    %cst_10 = arith.constant 3.200000e+01 : f32
    %17 = vector.broadcast %cst_10 : f32 to vector<16x1xf32>
    %18 = arith.divf %16, %17 : vector<16x1xf32>
    %cst_11 = arith.constant 9.99999996E-13 : f32
    %19 = vector.broadcast %cst_11 : f32 to vector<16x1xf32>
    %20 = arith.addf %18, %19 : vector<16x1xf32>
    %21 = math.rsqrt %20 : vector<16x1xf32>
    %22 = vector.broadcast %21 : vector<16x1xf32> to vector<16x32xf32>
    %23 = arith.mulf %13, %22 : vector<16x32xf32>
    %c0_12 = arith.constant 0 : index
    %c0_13 = arith.constant 0 : index
    %24 = vector.load %arg5[%c0_12, %c0_13] : memref<1x32xf32, #tpu.memory_space<vmem>>, vector<1x32xf32>
    %25 = vector.broadcast %24 : vector<1x32xf32> to vector<16x32xf32>
    %26 = arith.mulf %23, %25 : vector<16x32xf32>
    %c0_14 = arith.constant 0 : index
    %c0_15 = arith.constant 0 : index
    %27 = vector.load %arg6[%c0_14, %c0_15] : memref<1x32xf32, #tpu.memory_space<vmem>>, vector<1x32xf32>
    %28 = vector.broadcast %27 : vector<1x32xf32> to vector<16x32xf32>
    %29 = arith.addf %26, %28 : vector<16x32xf32>
    %c0_16 = arith.constant 0 : index
    %c0_17 = arith.constant 0 : index
    %30 = vector.load %arg7[%c0_16, %c0_17] : memref<16x32xf32, #tpu.memory_space<vmem>>, vector<16x32xf32>
    tpu.vector_store %arg7[%c0_16, %c0_17], %29 {strides = array<i32>} : memref<16x32xf32, #tpu.memory_space<vmem>>, vector<16x32xf32>,
    return
  }
  func.func @transform_0(%arg0: i32) -> (i32, i32) {
    %c0_i32 = arith.constant 0 : i32
    %c0_i32_0 = arith.constant 0 : i32
    return %arg0, %c0_i32 : i32, i32
  }
  func.func @transform_1(%arg0: i32) -> (i32, i32) {
    %c0_i32 = arith.constant 0 : i32
    %c0_i32_0 = arith.constant 0 : i32
    return %arg0, %c0_i32 : i32, i32
  }
  func.func @transform_2(%arg0: i32) -> (i32, i32) {
    %c0_i32 = arith.constant 0 : i32
    %c0_i32_0 = arith.constant 0 : i32
    %c0_i32_1 = arith.constant 0 : i32
    return %c0_i32, %c0_i32_0 : i32, i32
  }
  func.func @transform_3(%arg0: i32) -> (i32, i32) {
    %c0_i32 = arith.constant 0 : i32
    %c0_i32_0 = arith.constant 0 : i32
    %c0_i32_1 = arith.constant 0 : i32
    return %c0_i32, %c0_i32_0 : i32, i32
  }
  func.func @transform_4(%arg0: i32) -> (i32, i32) {
    %c0_i32 = arith.constant 0 : i32
    %c0_i32_0 = arith.constant 0 : i32
    %c0_i32_1 = arith.constant 0 : i32
    return %c0_i32, %c0_i32_0 : i32, i32
  }
  func.func @transform_5(%arg0: i32) -> (i32, i32) {
    %c0_i32 = arith.constant 0 : i32
    %c0_i32_0 = arith.constant 0 : i32
    %c0_i32_1 = arith.constant 0 : i32
    return %c0_i32, %c0_i32_0 : i32, i32
  }
  func.func @transform_6(%arg0: i32) -> (i32, i32) {
    %c0_i32 = arith.constant 0 : i32
    %c0_i32_0 = arith.constant 0 : i32
    return %arg0, %c0_i32 : i32, i32
  }
}

</mosaic_0001>

<bundles_post_ra>
// kernel: tpu_custom_call.1
= control target key start
LH: loop header
LB: loop body
LE: loop exit
PB: predicated region body
PF: predicated region fallthrough
CT: control target
= control target key end

     0   :  { %11 = vsyncpa [#allocation3], 0  ;;  %s453_s0 = inlined_call_operand.hbm [shape: f32[16,32], index: 0, kind: input, shape index: {}]   ;;  %s454_s1 = inlined_call_operand.hbm [shape: f32[16,32], index: 1, kind: input, shape index: {}]   ;;  %s455_s2 = inlined_call_operand.hbm [shape: f32[32,32], index: 2, kind: input, shape index: {}]   ;;  %s456_s3 = inlined_call_operand.vmem [shape: f32[1,32], index: 3, kind: input, shape index: {}]   ;;  %s457_s4 = inlined_call_operand.vmem [shape: f32[1,32], index: 4, kind: input, shape index: {}]   ;;  %s458_s5 = inlined_call_operand.vmem [shape: f32[1,32], index: 5, kind: input, shape index: {}]   ;;  %s459_s6 = inlined_call_operand.hbm [shape: f32[16,32], index: 6, kind: output, shape index: {}]  }
   0x1   :  { %12 = vsyncpa [#allocation6], 0 }
   0x2   :  { %13 = vsyncpa [#allocation4], 0  ;;  %s363_s21 = smov [#allocation5]   ;;  %s364_s23 = smov [#allocation2]  }
   0x3   :  { %s31_s22 = sshll.u32 %s363_s21, 4  ;;  %s19_s24 = sshll.u32 %s364_s23, 4  ;;  %s32_s22 = int_to_ptr.vmem [resolvable:$true] %s31_s22  ;;  %s20_s24 = int_to_ptr.vmem [resolvable:$true] %s19_s24 }
   0x4   :  { %s285_s25 = scalar_lea.vmem %s32_s22, 256  ;;  %p290_p1 = scmp.lt.s32.totalorder %s32_s22, %s32_s22 }
   0x5   :  { %p286_p0 = scmp.ne.s32.totalorder %s32_s22, %s285_s25  ;;  %p291_p2 = scmp.lt.s32.totalorder %s285_s25, %s285_s25 }
   0x7   :  { %p292_p3 = por %p291_p2, %p290_p1 }
   0x9   :  { %p293_p4 = pnand %p292_p3, %p286_p0 }
   0xb   :  { %296 = shalt.err (!%p293_p4)
}
   0xc   :  { %s365_s26 = smov 128   ;;  %s366_s27 = smov 8  }
   0xd   :  { %37 = dma.hbm_to_vmem [thread:$0]  %s454_s1, 256, %s32_s22, [#allocation6], %s365_s26, %s365_s26, %s366_s27  }
   0xe   :  { %s305_s30 = scalar_lea.vmem %s20_s24, 256  ;;  %p310_p6 = scmp.lt.s32.totalorder %s20_s24, %s20_s24 }
   0xf   :  { %p306_p5 = scmp.ne.s32.totalorder %s20_s24, %s305_s30  ;;  %p311_p7 = scmp.lt.s32.totalorder %s305_s30, %s305_s30 }
  0x11   :  { %p312_p8 = por %p311_p7, %p310_p6 }
  0x13   :  { %p313_p9 = pnand %p312_p8, %p306_p5 }
  0x15   :  { %316 = shalt.err (!%p313_p9)
}
  0x16   :  { %25 = dma.hbm_to_vmem [thread:$0]  %s453_s0, 256, %s20_s24, [#allocation3], %s365_s26, %s365_s26, %s366_s27  }
  0x17   :  { %s367_s9 = smov [#allocation7]  }
  0x18   :  { %s43_s10 = sshll.u32 %s367_s9, 4  ;;  %s44_s10 = int_to_ptr.vmem [resolvable:$true] %s43_s10 }
  0x19   :  { %s325_s11 = scalar_lea.vmem %s44_s10, 512  ;;  %p330_p11 = scmp.lt.s32.totalorder %s44_s10, %s44_s10 }
  0x1a   :  { %p326_p10 = scmp.ne.s32.totalorder %s44_s10, %s325_s11  ;;  %p331_p12 = scmp.lt.s32.totalorder %s325_s11, %s325_s11 }
  0x1c   :  { %p332_p13 = por %p331_p12, %p330_p11 }
  0x1e   :  { %p333_p0 = pnand %p332_p13, %p326_p10 }
  0x20   :  { %336 = shalt.err (!%p333_p0)
}
  0x21   :  { %49 = dma.hbm_to_vmem [thread:$0]  %s455_s2, 512, %s44_s10, [#allocation6], %s365_s26, %s365_s26, %s366_s27  }
  0x22   :  { %357 = dma.done.wait [#allocation3], 256  }
  0x23   :  { %358 = vsyncadd [#allocation3], 4294967040 }
  0x24   :  { %359 = dma.done.wait [#allocation6], 768  }
  0x25   :  { %360 = vsyncadd [#allocation6], 4294966528  ;;  %vm78_vm0 = vcmask 261120   ;;  %v70_v0 = vld [vmem:[#allocation7 + $0x18] sm:$0xff]  ;;  %v69_v1 = vld [vmem:[#allocation7 + $0x10] sm:$0xff]  ;;  %s368_s16 = smov [#allocation8]  }
  0x26   :  { %256 = vmatprep.subr.msk.mxu0 %vm78_vm0, %v70_v0  ;;  %v65_v2 = vld [vmem:[#allocation2] sm:$0xff]  ;;  %v68_v3 = vld [vmem:[#allocation7 + $0x8] sm:$0xff]  ;;  %v172_v9 = vld [vmem:[#allocation5] sm:$0xff]  ;;  %s228_s17 = sshll.u32 %s368_s16, 4  ;;  %s229_s17 = int_to_ptr.vmem [resolvable:$true] %s228_s17 }
  0x27   :  { %257 = vmatpush3.xpose.msk.msra.mxu0 %vm78_vm0, %v70_v0  ;;  %264 = vmatprep.mubr.msk.f32.mxu0 %vm78_vm0, %v65_v2  ;;  %v67_v4 = vld [vmem:[#allocation7] sm:$0xff]  ;;  %v66_v5 = vld [vmem:[#allocation2 + $0x8] sm:$0xff]  ;;  %v173_v12 = vld [vmem:[#allocation5 + $0x8] sm:$0xff]  ;;  %s337_s18 = scalar_lea.vmem %s229_s17, 256  ;;  %p342_p2 = scmp.lt.s32.totalorder %s229_s17, %s229_s17 }
  0x28   :  { %258 = vmatprep.subr.msk.mxu0 %vm78_vm0, %v69_v1  ;;  %v241_v7 = vld [vmem:[%s456_s3] ss:$0 sm:$0xff]  ;;  %p338_p1 = scmp.ne.s32.totalorder %s229_s17, %s337_s18  ;;  %p343_p3 = scmp.lt.s32.totalorder %s337_s18, %s337_s18 }
  0x29   :  { %v248_v34 = vld [vmem:[%s457_s4] ss:$0 sm:$0xff] }
  0x2a   :  { %v249_v36 = vld [vmem:[%s458_s5] ss:$0 sm:$0xff]  ;;  %p344_p4 = por %p343_p3, %p342_p2 }
  0x2b   :  { %259 = vmatpush3.xpose.msk.msra.mxu0 %vm78_vm0, %v69_v1 }
  0x2c   :  { %260 = vmatprep.subr.msk.mxu0 %vm78_vm0, %v68_v3  ;;  %p345_p5 = pnand %p344_p4, %p338_p1 }
  0x2f   :  { %261 = vmatpush3.xpose.msk.msra.mxu0 %vm78_vm0, %v68_v3 }
  0x30   :  { %262 = vmatprep.subr.msk.mxu0 %vm78_vm0, %v67_v4 }
  0x33   :  { %263 = vmatpush3.xpose.msk.msra.mxu0 %vm78_vm0, %v67_v4 }
  0x36   :  { %265 = vmatmul.mubr.msk.f32.vlgmr.msra.gmra.mxu0 %vm78_vm0, %v66_v5 }
  0xf6   :  { %v266_v6 = vpop.f32.mrf.mxu0 }
  0xf7   :  { %v169_v10 = vadd.f32 %v266_v6, %v241_v7 }
  0xf8   :  { %v163_v8 = vpop.f32.mrf.mxu0 }
  0xf9   :  { %v164_v11 = vadd.f32 %v241_v7, %v163_v8  ;;  %v175_v15 = vadd.f32 %v173_v12, %v169_v10 }
  0xfb   :  { %v174_v13 = vadd.f32 %v172_v9, %v164_v11  ;;  %v179_v16 = vsel %vm78_vm0, %v175_v15, 0.0 }
  0xfd   :  { %v176_v14 = vsel %vm78_vm0, %v174_v13, 0.0 }
  0xfe   :  { %177 = vadd.xlane.f32.xlu0 %v176_v14 }
 0x102   :  { %180 = vadd.xlane.f32.xlu0 %v179_v16 }
 0x187   :  { %v178_v17 = vpop.xlane.xlu0 %177 }
 0x188   :  { %v183_v18 = vmul.f32 0.03125, %v178_v17 }
 0x18a   :  { %v185_v19 = vsub.f32 %v174_v13, %v183_v18 }
 0x18b   :  { %v181_v20 = vpop.xlane.xlu0 %180 }
 0x18c   :  { %v184_v21 = vmul.f32 0.03125, %v181_v20  ;;  %v187_v22 = vmul.f32 %v185_v19, %v185_v19 }
 0x18e   :  { %v186_v23 = vsub.f32 %v175_v15, %v184_v21  ;;  %v189_v24 = vsel %vm78_vm0, %v187_v22, 0.0 }
 0x18f   :  { %190 = vadd.xlane.f32.xlu1 %v189_v24 }
 0x190   :  { %v188_v25 = vmul.f32 %v186_v23, %v186_v23 }
 0x192   :  { %v192_v26 = vsel %vm78_vm0, %v188_v25, 0.0 }
 0x193   :  { %193 = vadd.xlane.f32.xlu1 %v192_v26 }
 0x218   :  { %v191_v27 = vpop.xlane.xlu1 %190 }
 0x219   :  { %v195_v28 = vmul.f32 0.03125, %v191_v27 }
 0x21b   :  { %v197_v29 = vadd.f32 1e-12, %v195_v28 }
 0x21c   :  { %v194_v30 = vpop.xlane.xlu1 %193 }
 0x21d   :  { %273 = vrsqrt.f32 %v197_v29  ;;  %v196_v31 = vmul.f32 0.03125, %v194_v30 }
 0x21f   :  { %v198_v32 = vadd.f32 1e-12, %v196_v31 }
 0x221   :  { %275 = vrsqrt.f32 %v198_v32 }
 0x22a   :  { %v274_v33 = vpop.eup %273 }
 0x22b   :  { %v201_v35 = vmul.f32 %v274_v33, %v185_v19 }
 0x22d   :  { %v210_v37 = vmul.f32 %v248_v34, %v201_v35 }
 0x22e   :  { %v276_v38 = vpop.eup %275 }
 0x22f   :  { %v202_v39 = vmul.f32 %v276_v38, %v186_v23  ;;  %v219_v40 = vadd.f32 %v249_v36, %v210_v37 }
 0x231   :  { %v211_v41 = vmul.f32 %v248_v34, %v202_v39  ;;  %221 = vst.msk [vmem:[#allocation8] sm:$0xff] %vm78_vm0, %v219_v40 }
 0x233   :  { %v220_v42 = vadd.f32 %v249_v36, %v211_v41 }
 0x235   :  { %222 = vst.msk [vmem:[#allocation8 + $0x8] sm:$0xff] %vm78_vm0, %v220_v42 }
 0x236   :  { %348 = shalt.err (!%p345_p5)
}
 0x237   :  { %234 = dma.vmem_to_hbm [thread:$0]  %s229_s17, 256, %s459_s6, [#allocation4], %s365_s26, %s365_s26, %s366_s27  }
 0x238   :  { %361 = dma.done.wait [#allocation4], 256  }
 0x239   :  { %362 = vsyncadd [#allocation4], 4294967040 }
 0x23a   :  { %238 = vsyncpa [#allocation3], 1 }
 0x23b   :  { %239 = vsyncpa [#allocation6], 1 }
 0x23c   :  { %240 = vsyncpa [#allocation4], 1 }

</bundles_post_ra>
